<compile_context>
chip_gen: v6e
topology: v6e:2x2x1
jax: 0.10.0
libtpu: 0.0.40
codegen_flags: <defaults>
</compile_context>

<pallas_src>
import functools
import numpy as np

import jax
import jax.numpy as jnp
from jax.experimental import pallas as pl
from jax.experimental.pallas import tpu as pltpu


# -----------------------------------------------------------------------------
# Per-generation VMEM budget (leave headroom for Mosaic scratch / double bufs)
# -----------------------------------------------------------------------------
@functools.lru_cache(maxsize=None)
def _vmem_budget_bytes():
    cap = 64 * 1024 * 1024                      # conservative fallback (v7x)
    try:
        info = pltpu.get_tpu_info()
        cap = int(getattr(info, "vmem_capacity_bytes", cap))
    except Exception:
        pass
    return (cap * 4) // 5                       # ~80% of physical VMEM


def _round_up(x, m):
    return ((x + m - 1) // m) * m


def _fit(dim, cap, align):
    """Largest tile <= cap that divides `dim` and is a multiple of `align`
    (falls back to the full dim, which always satisfies the (8,128) rule)."""
    if dim <= cap:
        return dim
    t = (cap // align) * align
    while t >= align:
        if dim % t == 0:
            return t
        t -= align
    return dim


def _gelu(y):
    # tanh-approx GELU.
    # TODO(synk): BERT checkpoints use exact erf GELU; switch if erf lowering is desired.
    c = 0.7978845608028654  # sqrt(2/pi)
    return 0.5 * y * (1.0 + jnp.tanh(c * (y + 0.044715 * y * y * y)))


# -----------------------------------------------------------------------------
# Kernels
# -----------------------------------------------------------------------------
def _linear_kernel(x_ref, w_ref, b_ref, *o_refs, splits, activation):
    """x @ W + b (+act), weight fully VMEM-resident (no K/N grid axes).
    Optionally splits the N columns into multiple outputs (fused QKV)."""
    y = jnp.dot(x_ref[...], w_ref[...],
                preferred_element_type=jnp.float32) + b_ref[...]
    if activation == "gelu":
        y = _gelu(y)
    elif activation == "relu":
        y = jnp.maximum(y, 0.0)
    off = 0
    for o_ref, width in zip(o_refs, splits):
        o_ref[...] = y[:, off:off + width].astype(o_ref.dtype)
        off += width


def _linear_ln_kernel(*refs, activation, eps, has_residual):
    """x @ W + b (+act) (+residual) + LayerNorm fused; weight VMEM-resident."""
    if has_residual:
        x_ref, w_ref, b_ref, res_ref, g_ref, bt_ref, o_ref = refs
    else:
        x_ref, w_ref, b_ref, g_ref, bt_ref, o_ref = refs
        res_ref = None
    y = jnp.dot(x_ref[...], w_ref[...],
                preferred_element_type=jnp.float32) + b_ref[...]
    if activation == "gelu":
        y = _gelu(y)
    elif activation == "relu":
        y = jnp.maximum(y, 0.0)
    if has_residual:
        y = y + res_ref[...].astype(jnp.float32)
    mu = jnp.mean(y, axis=-1, keepdims=True)
    var = jnp.mean((y - mu) * (y - mu), axis=-1, keepdims=True)
    o_ref[...] = ((y - mu) * jax.lax.rsqrt(var + eps) * g_ref[...]
                  + bt_ref[...]).astype(o_ref.dtype)


def _emb_ln_kernel(we_ref, pe_ref, te_ref, g_ref, b_ref, o_ref, *, eps):
    """Fused (word + pos + type) embedding add + LayerNorm."""
    x = (we_ref[0].astype(jnp.float32) + pe_ref[0].astype(jnp.float32)
         + te_ref[0].astype(jnp.float32))
    mu = jnp.mean(x, axis=-1, keepdims=True)
    var = jnp.mean((x - mu) * (x - mu), axis=-1, keepdims=True)
    o_ref[0] = ((x - mu) * jax.lax.rsqrt(var + eps) * g_ref[...]
                + b_ref[...]).astype(o_ref.dtype)


def _attn_kernel(q_ref, k_ref, v_ref, m_ref, o_ref, m_sc, l_sc, acc_sc,
                 *, hg, dh, scale):
    """Flash-style attention: grid (B, head_group, KV); online softmax in
    VMEM scratch; hg (1-2) heads per step so the output block is lane-dense."""
    kv = pl.program_id(2)

    @pl.when(kv == 0)
    def _():
        m_sc[...] = jnp.full_like(m_sc, -1e30)
        l_sc[...] = jnp.zeros_like(l_sc)
        acc_sc[...] = jnp.zeros_like(acc_sc)

    bias = (1.0 - m_ref[0]) * -1e9                     # [1, tkv] key-mask bias

    for h in range(hg):                                # hg <= 2: tiny static unroll
        q = q_ref[0, :, h * dh:(h + 1) * dh]           # [S,  dh] bf16
        k = k_ref[0, :, h * dh:(h + 1) * dh]           # [tkv, dh]
        v = v_ref[0, :, h * dh:(h + 1) * dh]
        # contract last dims directly (no .T -> no XLU transpose)
        s = jax.lax.dot_general(q, k, (((1,), (1,)), ((), ())),
                                preferred_element_type=jnp.float32)
        s = s * scale + bias                           # [S, tkv]
        m_prev = m_sc[h]                               # [S, 1]
        m_new = jnp.maximum(m_prev, jnp.max(s, axis=-1, keepdims=True))
        alpha = jnp.exp(m_prev - m_new)
        p = jnp.exp(s - m_new)
        l_sc[h] = alpha * l_sc[h] + jnp.sum(p, axis=-1, keepdims=True)
        acc_sc[h] = alpha * acc_sc[h] + jnp.dot(p.astype(v.dtype), v,
                                                preferred_element_type=jnp.float32)
        m_sc[h] = m_new

    @pl.when(kv == pl.num_programs(2) - 1)
    def _():
        parts = [acc_sc[h] * pl.reciprocal(l_sc[h], approx=True)
                 for h in range(hg)]
        out = parts[0] if hg == 1 else jnp.concatenate(parts, axis=-1)
        o_ref[0] = out.astype(o_ref.dtype)


def _dec_splade_kernel(t_ref, w_ref, b_ref, cm_ref, am_ref, o_ref, acc_ref):
    """Fused MLM decoder matmul + SPLADE max-aggregation.
    Grid (V/tv, B, S/ts) -- vocab OUTERMOST so the [H,tv] weight stays resident.
    log(1+x) is applied once at finalize (monotone; masks are {0,1})."""
    sj = pl.program_id(2)

    @pl.when(sj == 0)
    def _():
        acc_ref[...] = jnp.zeros_like(acc_ref)

    logits = jnp.dot(t_ref[0], w_ref[...],
                     preferred_element_type=jnp.float32) + b_ref[...]   # [ts, tv]
    cm = cm_ref[0]                                                      # [ts, 1]
    am = am_ref[0]                                                      # [ts, 1]
    vals = jnp.maximum(logits * cm, 0.0) * am                           # relu-masked
    acc_ref[...] = jnp.maximum(acc_ref[...],
                               jnp.max(vals, axis=0, keepdims=True))

    @pl.when(sj == pl.num_programs(2) - 1)
    def _():
        o_ref[0] = jnp.log(1.0 + acc_ref[...])


# -----------------------------------------------------------------------------
# Wrappers
# -----------------------------------------------------------------------------
def linear(x, w, b, activation=None, out_dtype=jnp.bfloat16, splits=None):
    """x @ W + b (+act).  Weight VMEM-resident; grid over M only.
    splits=(n1,n2,...) returns multiple column-split outputs (fused QKV)."""
    M, K = x.shape
    N = w.shape[1]
    single = splits is None
    if single:
        splits = (N,)
    assert sum(splits) == N
    x = x.astype(jnp.bfloat16)
    w = w.astype(jnp.bfloat16)
    b = b.astype(jnp.float32)
    tm = _fit(M, 512, 8)

    if single:
        out_shape = jax.ShapeDtypeStruct((M, N), out_dtype)
        out_specs = pl.BlockSpec((tm, N), lambda i: (i, 0))
    else:
        out_shape = tuple(jax.ShapeDtypeStruct((M, n), out_dtype) for n in splits)
        out_specs = [pl.BlockSpec((tm, n), lambda i: (i, 0)) for n in splits]

    cost = pl.CostEstimate(
        flops=2 * M * N * K,
        transcendentals=M * N if activation == "gelu" else 0,
        bytes_accessed=M * K * 2 + K * N * 2 + N * 4 + M * N * 2)

    outs = pl.pallas_call(
        functools.partial(_linear_kernel, splits=tuple(splits),
                          activation=activation),
        out_shape=out_shape,
        grid=(M // tm,),
        in_specs=[
            pl.BlockSpec((tm, K), lambda i: (i, 0)),
            pl.BlockSpec((K, N), lambda i: (0, 0)),   # weight resident
            pl.BlockSpec((1, N), lambda i: (0, 0)),
        ],
        out_specs=out_specs,
        compiler_params=pltpu.CompilerParams(
            dimension_semantics=("parallel",),
            vmem_limit_bytes=_vmem_budget_bytes()),
        cost_estimate=cost,
    )(x, w, b)
    return outs


def linear_ln(x, w, b, gamma, beta, residual=None, activation=None,
              eps=1e-12, out_dtype=jnp.bfloat16):
    """x @ W + b (+act) (+residual) + LayerNorm.  Weight VMEM-resident."""
    M, K = x.shape
    N = w.shape[1]
    x = x.astype(jnp.bfloat16)
    w = w.astype(jnp.bfloat16)
    tm = _fit(M, 512, 8)
    has_res = residual is not None

    in_specs = [
        pl.BlockSpec((tm, K), lambda i: (i, 0)),
        pl.BlockSpec((K, N), lambda i: (0, 0)),       # weight resident
        pl.BlockSpec((1, N), lambda i: (0, 0)),
    ]
    args = [x, w, b.astype(jnp.float32)]
    if has_res:
        in_specs.append(pl.BlockSpec((tm, N), lambda i: (i, 0)))
        args.append(residual)                         # native dtype, upcast in kernel
    in_specs += [pl.BlockSpec((1, N), lambda i: (0, 0)),
                 pl.BlockSpec((1, N), lambda i: (0, 0))]
    args += [gamma.astype(jnp.float32), beta.astype(jnp.float32)]

    cost = pl.CostEstimate(flops=2 * M * N * K, transcendentals=M * N,
                           bytes_accessed=M * K * 2 + K * N * 2 + 2 * M * N * 2)
    return pl.pallas_call(
        functools.partial(_linear_ln_kernel, activation=activation,
                          eps=eps, has_residual=has_res),
        out_shape=jax.ShapeDtypeStruct((M, N), out_dtype),
        grid=(M // tm,),
        in_specs=in_specs,
        out_specs=pl.BlockSpec((tm, N), lambda i: (i, 0)),
        compiler_params=pltpu.CompilerParams(
            dimension_semantics=("parallel",),
            vmem_limit_bytes=_vmem_budget_bytes()),
        cost_estimate=cost,
    )(*args)


def embed_layernorm(we, pe, te, gamma, beta, eps=1e-12, out_dtype=jnp.bfloat16):
    """Fused (word + pos + type) add + LayerNorm. we/te: [B,S,H], pe: [1,S,H]."""
    B, S, H = we.shape
    ts = _fit(S, 512, 8)
    return pl.pallas_call(
        functools.partial(_emb_ln_kernel, eps=eps),
        out_shape=jax.ShapeDtypeStruct((B, S, H), out_dtype),
        grid=(B, S // ts),
        in_specs=[
            pl.BlockSpec((1, ts, H), lambda b, s: (b, s, 0)),
            pl.BlockSpec((1, ts, H), lambda b, s: (0, s, 0)),
            pl.BlockSpec((1, ts, H), lambda b, s: (b, s, 0)),
            pl.BlockSpec((1, H), lambda b, s: (0, 0)),
            pl.BlockSpec((1, H), lambda b, s: (0, 0)),
        ],
        out_specs=pl.BlockSpec((1, ts, H), lambda b, s: (b, s, 0)),
        compiler_params=pltpu.CompilerParams(
            dimension_semantics=("parallel", "parallel"),
            vmem_limit_bytes=_vmem_budget_bytes()),
    )(we, pe, te, gamma, beta)


def attention(q, k, v, mask_b1s, scale, nh):
    """q/k/v: [B, S, H] bf16, mask_b1s: [B, 1, S] f32 -> [B, S, H] bf16.
    Grid (B, head_group, KV): online softmax; 128-lane-aligned head groups."""
    B, S, H = q.shape
    dh = H // nh
    # smallest head group whose width is a 128-lane multiple; else all heads
    hg = nh
    for g in range(1, nh + 1):
        if nh % g == 0 and (g * dh) % 128 == 0:
            hg = g
            break
    G = nh // hg
    wg = hg * dh
    tkv = _fit(S, 256, 128)

    kern = functools.partial(_attn_kernel, hg=hg, dh=dh, scale=scale)
    cost = pl.CostEstimate(flops=4 * B * S * S * H,
                           transcendentals=B * nh * S * S,
                           bytes_accessed=4 * B * S * H * 2 + B * S * 4)
    return pl.pallas_call(
        kern,
        out_shape=jax.ShapeDtypeStruct((B, S, H), jnp.bfloat16),
        grid=(B, G, S // tkv),
        in_specs=[
            pl.BlockSpec((1, S, wg), lambda b, g, kv: (b, 0, g)),
            pl.BlockSpec((1, tkv, wg), lambda b, g, kv: (b, kv, g)),
            pl.BlockSpec((1, tkv, wg), lambda b, g, kv: (b, kv, g)),
            pl.BlockSpec((1, 1, tkv), lambda b, g, kv: (b, 0, kv)),
        ],
        out_specs=pl.BlockSpec((1, S, wg), lambda b, g, kv: (b, 0, g)),
        scratch_shapes=[pltpu.VMEM((hg, S, 1), jnp.float32),
                        pltpu.VMEM((hg, S, 1), jnp.float32),
                        pltpu.VMEM((hg, S, dh), jnp.float32)],
        compiler_params=pltpu.CompilerParams(
            dimension_semantics=("parallel", "parallel", "arbitrary"),
            vmem_limit_bytes=_vmem_budget_bytes()),
        cost_estimate=cost,
    )(q.astype(jnp.bfloat16), k.astype(jnp.bfloat16), v.astype(jnp.bfloat16),
      mask_b1s.astype(jnp.float32))


def decoder_splade(t, dec_w, dec_b, context_mask, attn_mask):
    """t: [B, S, H]; dec_w: [H, V] -> reps [B, V].
    Vocab outermost so the weight tile is VMEM-resident across B and S;
    [B,S,V] logits never touch HBM; log1p applied once at finalize."""
    B, S, H = t.shape
    V = dec_w.shape[1]
    t = t.astype(jnp.bfloat16)
    dec_w = dec_w.astype(jnp.bfloat16)
    dec_b = dec_b.reshape(1, -1).astype(jnp.float32)

    budget = _vmem_budget_bytes()
    tv_cap = 8192 if budget >= 96 * 1024 * 1024 else 4096   # 128 MiB vs 64 MiB parts
    tv = min(tv_cap, _round_up(V, 128))
    Vp = _round_up(V, tv)
    if Vp != V:                         # zero-pad: padded columns yield exactly 0
        dec_w = jnp.pad(dec_w, ((0, 0), (0, Vp - V)))
        dec_b = jnp.pad(dec_b, ((0, 0), (0, Vp - V)))

    cm3 = context_mask.reshape(B, S, 1).astype(jnp.float32)
    am3 = attn_mask.reshape(B, S, 1).astype(jnp.float32)
    ts = _fit(S, 256, 8)

    cost = pl.CostEstimate(
        flops=2 * B * S * Vp * H,
        transcendentals=B * Vp,
        bytes_accessed=B * S * H * 2 * (Vp // tv) + H * Vp * 2 + B * Vp * 4)

    out = pl.pallas_call(
        _dec_splade_kernel,
        out_shape=jax.ShapeDtypeStruct((B, 1, Vp), jnp.float32),
        grid=(Vp // tv, B, S // ts),
        in_specs=[
            pl.BlockSpec((1, ts, H), lambda vj, bi, sj: (bi, sj, 0)),
            pl.BlockSpec((H, tv), lambda vj, bi, sj: (0, vj)),   # resident per vj
            pl.BlockSpec((1, tv), lambda vj, bi, sj: (0, vj)),
            pl.BlockSpec((1, ts, 1), lambda vj, bi, sj: (bi, sj, 0)),
            pl.BlockSpec((1, ts, 1), lambda vj, bi, sj: (bi, sj, 0)),
        ],
        out_specs=pl.BlockSpec((1, 1, tv), lambda vj, bi, sj: (bi, 0, vj)),
        scratch_shapes=[pltpu.VMEM((1, tv), jnp.float32)],
        compiler_params=pltpu.CompilerParams(
            dimension_semantics=("parallel", "parallel", "arbitrary"),
            vmem_limit_bytes=budget),
        cost_estimate=cost,
    )(t, dec_w, dec_b, cm3, am3)
    return out.reshape(B, Vp)[:, :V]


# -----------------------------------------------------------------------------
# Deterministic synthetic "BERT MLM" parameters (tiny config)
# -----------------------------------------------------------------------------
def init_params(seed=0):
    cfg = dict(hidden=32, heads=2, layers=2, intermediate=64,
               vocab=64, max_pos=16, type_vocab=2)
    H, I, V = cfg["hidden"], cfg["intermediate"], cfg["vocab"]

    key = jax.random.PRNGKey(seed)

    def nxt():
        nonlocal key
        key, sub = jax.random.split(key)
        return sub

    def lin_params(fan_in, fan_out):
        w = (0.02 * jax.random.normal(nxt(), (fan_in, fan_out),
                                      jnp.float32)).astype(jnp.bfloat16)
        b = jnp.zeros((1, fan_out), jnp.float32)
        return w, b

    params = {"cfg": cfg}
    params["word_emb"] = 0.02 * jax.random.normal(nxt(), (V, H), jnp.float32)
    params["pos_emb"] = 0.02 * jax.random.normal(nxt(), (cfg["max_pos"], H), jnp.float32)
    params["type_emb"] = 0.02 * jax.random.normal(nxt(), (cfg["type_vocab"], H), jnp.float32)
    params["emb_ln_g"] = jnp.ones((1, H), jnp.float32)
    params["emb_ln_b"] = jnp.zeros((1, H), jnp.float32)

    layers = []
    for _ in range(cfg["layers"]):
        L = {}
        wq, bq = lin_params(H, H)
        wk, bk = lin_params(H, H)
        wv, bv = lin_params(H, H)
        # Fused QKV projection: one [H, 3H] matmul, q/k/v emitted as 3 outputs.
        L["w_qkv"] = jnp.concatenate([wq, wk, wv], axis=1)
        L["b_qkv"] = jnp.concatenate([bq, bk, bv], axis=1)
        L["wo"], L["bo"] = lin_params(H, H)
        L["ln1_g"] = jnp.ones((1, H), jnp.float32)
        L["ln1_b"] = jnp.zeros((1, H), jnp.float32)
        L["wi"], L["bi"] = lin_params(H, I)
        L["wo2"], L["bo2"] = lin_params(I, H)
        L["ln2_g"] = jnp.ones((1, H), jnp.float32)
        L["ln2_b"] = jnp.zeros((1, H), jnp.float32)
        layers.append(L)
    params["layers"] = layers

    # MLM head ("cls"): transform (dense + gelu + LN) then decoder (tied word emb)
    params["mlm_w"], params["mlm_b"] = lin_params(H, H)
    params["mlm_ln_g"] = jnp.ones((1, H), jnp.float32)
    params["mlm_ln_b"] = jnp.zeros((1, H), jnp.float32)
    params["dec_w"] = params["word_emb"].T.astype(jnp.bfloat16)   # [H, V]
    params["dec_b"] = jnp.zeros((1, V), jnp.float32)
    return params


# -----------------------------------------------------------------------------
# SparseEncoder forward (output='MLM', agg='max', activation='relu', norm=False,
# cross_attention=False branch)
# -----------------------------------------------------------------------------
def sparse_encoder_forward(params, input_ids, attention_mask, token_type_ids=None,
                           context_mask=None):
    cfg = params["cfg"]
    B, S = input_ids.shape
    H, nh, V = cfg["hidden"], cfg["heads"], cfg["vocab"]
    dh = H // nh
    if token_type_ids is None:
        token_type_ids = jnp.zeros_like(input_ids)
    mask_f = attention_mask.astype(jnp.float32)

    # --- BERT embeddings: gathers in JAX, add + LN fused in one Pallas kernel ---
    we = jnp.take(params["word_emb"], input_ids, axis=0)            # [B,S,H]
    te = jnp.take(params["type_emb"], token_type_ids, axis=0)       # [B,S,H]
    pe = params["pos_emb"][:S][None, :, :]                          # [1,S,H]
    h3 = embed_layernorm(we, pe, te, params["emb_ln_g"], params["emb_ln_b"])
    h = h3.reshape(B * S, H)                                        # bf16

    all_hidden_states = [h3]
    mask_b1s = mask_f[:, None, :]                                   # [B,1,S]
    scale = 1.0 / float(np.sqrt(dh))

    # --- BERT encoder layers (bf16 activations, f32 math inside kernels) ---
    for L in params["layers"]:
        q, k, v = linear(h, L["w_qkv"], L["b_qkv"], splits=(H, H, H),
                         out_dtype=jnp.bfloat16)
        ctx = attention(q.reshape(B, S, H), k.reshape(B, S, H),
                        v.reshape(B, S, H), mask_b1s, scale, nh)    # [B,S,H] bf16
        # attention output projection + residual + LayerNorm fused
        h = linear_ln(ctx.reshape(B * S, H), L["wo"], L["bo"],
                      L["ln1_g"], L["ln1_b"], residual=h)
        # FFN: dense+gelu, then dense + residual + LayerNorm fused
        inter = linear(h, L["wi"], L["bi"], activation="gelu",
                       out_dtype=jnp.bfloat16)
        h = linear_ln(inter, L["wo2"], L["bo2"],
                      L["ln2_g"], L["ln2_b"], residual=h)
        all_hidden_states.append(h.reshape(B, S, H))

    last_hidden_states = h.reshape(B, S, H)

    # --- MLM head transform (dense + gelu + LN fused, no residual) ---
    t = linear_ln(h, params["mlm_w"], params["mlm_b"],
                  params["mlm_ln_g"], params["mlm_ln_b"], activation="gelu")

    # --- Fused decoder matmul + SPLADE aggregation ---
    # logits = (t @ dec_w + dec_b) * (context_mask or attention_mask)
    # values = max_seq( log(1 + relu(logits)) * attention_mask )
    ctx_mask_f = mask_f if context_mask is None else context_mask.astype(jnp.float32)
    values = decoder_splade(t.reshape(B, S, H), params["dec_w"], params["dec_b"],
                            ctx_mask_f, mask_f)

    return {
        "reps": values,                         # [B, V]
        "logits": None,                         # tok_logits (cross-attn branch only)
        "last_hidden_states": last_hidden_states,
        "all_hidden_states": all_hidden_states,
        "mask": attention_mask,
    }


# -----------------------------------------------------------------------------
if __name__ == "__main__":
    params = init_params(seed=0)
    cfg = params["cfg"]
    B, S = 2, 8

    key = jax.random.PRNGKey(0)
    k_ids, _ = jax.random.split(key)
    input_ids = jax.random.randint(k_ids, (B, S), 0, cfg["vocab"], dtype=jnp.int32)
    lengths = jnp.array([8, 5], dtype=jnp.int32)
    attention_mask = (jnp.arange(S)[None, :] < lengths[:, None]).astype(jnp.int32)
    token_type_ids = jnp.zeros((B, S), dtype=jnp.int32)

    out = sparse_encoder_forward(params, input_ids, attention_mask, token_type_ids)
    reps = jax.block_until_ready(out["reps"])
    jax.block_until_ready(out["last_hidden_states"])

    # nonzero_indices: per-row dynamic-shape extraction -> host side (numpy)
    reps_np = np.asarray(reps)
    nonzero_indices = [np.nonzero(row)[0] for row in reps_np]

    assert reps.shape == (B, cfg["vocab"])
    assert out["last_hidden_states"].shape == (B, S, cfg["hidden"])
    assert len(out["all_hidden_states"]) == cfg["layers"] + 1
    assert len(nonzero_indices) == B
    assert np.all(reps_np >= 0.0)
    assert np.all(np.isfinite(reps_np))

    print("KERNEL_OK")
</pallas_src>

<mosaic_0001>
module attributes {stable_mosaic.version = 11 : i64} {
  func.func @_emb_ln_kernel(%arg0: i32, %arg1: i32, %arg2: memref<1x8x32xf32, #tpu.memory_space<vmem>>, %arg3: memref<1x8x32xf32, #tpu.memory_space<vmem>>, %arg4: memref<1x8x32xf32, #tpu.memory_space<vmem>>, %arg5: memref<1x32xf32, #tpu.memory_space<vmem>>, %arg6: memref<1x32xf32, #tpu.memory_space<vmem>>, %arg7: memref<1x8x32xbf16, #tpu.memory_space<vmem>>) attributes {dimension_semantics = [#tpu.dimension_semantics<parallel>, #tpu.dimension_semantics<parallel>], iteration_bounds = array<i64: 2, 1>, scalar_prefetch = 0 : i64, scratch_operands = 0 : i64, tpu.core_type = #tpu.core_type<tc>, window_params = [{transform_indices = @transform_0, window_bounds = array<i64: 1, 8, 32>}, {transform_indices = @transform_1, window_bounds = array<i64: 1, 8, 32>}, {transform_indices = @transform_2, window_bounds = array<i64: 1, 8, 32>}, {pipeline_mode = #tpu.pipeline_mode<synchronous>, transform_indices = @transform_3, window_bounds = array<i64: 1, 32>}, {pipeline_mode = #tpu.pipeline_mode<synchronous>, transform_indices = @transform_4, window_bounds = array<i64: 1, 32>}, {transform_indices = @transform_5, window_bounds = array<i64: 1, 8, 32>}]} {
    %c0 = arith.constant 0 : index
    %c0_0 = arith.constant 0 : index
    %c0_1 = arith.constant 0 : index
    %0 = vector.load %arg2[%c0, %c0_0, %c0_1] : memref<1x8x32xf32, #tpu.memory_space<vmem>>, vector<1x8x32xf32>
    %1 = vector.shape_cast %0 : vector<1x8x32xf32> to vector<8x32xf32>
    %c0_2 = arith.constant 0 : index
    %c0_3 = arith.constant 0 : index
    %c0_4 = arith.constant 0 : index
    %2 = vector.load %arg3[%c0_2, %c0_3, %c0_4] : memref<1x8x32xf32, #tpu.memory_space<vmem>>, vector<1x8x32xf32>
    %3 = vector.shape_cast %2 : vector<1x8x32xf32> to vector<8x32xf32>
    %4 = arith.addf %1, %3 : vector<8x32xf32>
    %c0_5 = arith.constant 0 : index
    %c0_6 = arith.constant 0 : index
    %c0_7 = arith.constant 0 : index
    %5 = vector.load %arg4[%c0_5, %c0_6, %c0_7] : memref<1x8x32xf32, #tpu.memory_space<vmem>>, vector<1x8x32xf32>
    %6 = vector.shape_cast %5 : vector<1x8x32xf32> to vector<8x32xf32>
    %7 = arith.addf %4, %6 : vector<8x32xf32>
    %cst = arith.constant dense<0.000000e+00> : vector<8xf32>
    %8 = vector.multi_reduction <add>, %7, %cst [1] : vector<8x32xf32> to vector<8xf32>
    %9 = vector.shape_cast %8 : vector<8xf32> to vector<8x1xf32>
    %cst_8 = arith.constant 3.200000e+01 : f32
    %10 = vector.broadcast %cst_8 : f32 to vector<8x1xf32>
    %11 = arith.divf %9, %10 : vector<8x1xf32>
    %12 = vector.broadcast %11 : vector<8x1xf32> to vector<8x32xf32>
    %13 = arith.subf %7, %12 : vector<8x32xf32>
    %14 = vector.broadcast %11 : vector<8x1xf32> to vector<8x32xf32>
    %15 = arith.subf %7, %14 : vector<8x32xf32>
    %16 = arith.mulf %13, %15 : vector<8x32xf32>
    %cst_9 = arith.constant dense<0.000000e+00> : vector<8xf32>
    %17 = vector.multi_reduction <add>, %16, %cst_9 [1] : vector<8x32xf32> to vector<8xf32>
    %18 = vector.shape_cast %17 : vector<8xf32> to vector<8x1xf32>
    %cst_10 = arith.constant 3.200000e+01 : f32
    %19 = vector.broadcast %cst_10 : f32 to vector<8x1xf32>
    %20 = arith.divf %18, %19 : vector<8x1xf32>
    %21 = vector.broadcast %11 : vector<8x1xf32> to vector<8x32xf32>
    %22 = arith.subf %7, %21 : vector<8x32xf32>
    %cst_11 = arith.constant 9.99999996E-13 : f32
    %23 = vector.broadcast %cst_11 : f32 to vector<8x1xf32>
    %24 = arith.addf %20, %23 : vector<8x1xf32>
    %25 = math.rsqrt %24 : vector<8x1xf32>
    %26 = vector.broadcast %25 : vector<8x1xf32> to vector<8x32xf32>
    %27 = arith.mulf %22, %26 : vector<8x32xf32>
    %c0_12 = arith.constant 0 : index
    %c0_13 = arith.constant 0 : index
    %28 = vector.load %arg5[%c0_12, %c0_13] : memref<1x32xf32, #tpu.memory_space<vmem>>, vector<1x32xf32>
    %29 = vector.broadcast %28 : vector<1x32xf32> to vector<8x32xf32>
    %30 = arith.mulf %27, %29 : vector<8x32xf32>
    %c0_14 = arith.constant 0 : index
    %c0_15 = arith.constant 0 : index
    %31 = vector.load %arg6[%c0_14, %c0_15] : memref<1x32xf32, #tpu.memory_space<vmem>>, vector<1x32xf32>
    %32 = vector.broadcast %31 : vector<1x32xf32> to vector<8x32xf32>
    %33 = arith.addf %30, %32 : vector<8x32xf32>
    %34 = arith.truncf %33 : vector<8x32xf32> to vector<8x32xbf16>
    %c0_16 = arith.constant 0 : index
    %c0_17 = arith.constant 0 : index
    %c0_18 = arith.constant 0 : index
    %35 = vector.load %arg7[%c0_16, %c0_17, %c0_18] : memref<1x8x32xbf16, #tpu.memory_space<vmem>>, vector<1x8x32xbf16>
    %36 = vector.shape_cast %35 : vector<1x8x32xbf16> to vector<8x32xbf16>
    %37 = vector.shape_cast %34 : vector<8x32xbf16> to vector<1x8x32xbf16>
    tpu.vector_store %arg7[%c0_16, %c0_17, %c0_18], %37 {strides = array<i32>} : memref<1x8x32xbf16, #tpu.memory_space<vmem>>, vector<1x8x32xbf16>,
    return
  }
  func.func @transform_0(%arg0: i32, %arg1: i32) -> (i32, i32, i32) {
    %c0_i32 = arith.constant 0 : i32
    %c0_i32_0 = arith.constant 0 : i32
    return %arg0, %arg1, %c0_i32 : i32, i32, i32
  }
  func.func @transform_1(%arg0: i32, %arg1: i32) -> (i32, i32, i32) {
    %c0_i32 = arith.constant 0 : i32
    %c0_i32_0 = arith.constant 0 : i32
    %c0_i32_1 = arith.constant 0 : i32
    return %c0_i32, %arg1, %c0_i32_0 : i32, i32, i32
  }
  func.func @transform_2(%arg0: i32, %arg1: i32) -> (i32, i32, i32) {
    %c0_i32 = arith.constant 0 : i32
    %c0_i32_0 = arith.constant 0 : i32
    return %arg0, %arg1, %c0_i32 : i32, i32, i32
  }
  func.func @transform_3(%arg0: i32, %arg1: i32) -> (i32, i32) {
    %c0_i32 = arith.constant 0 : i32
    %c0_i32_0 = arith.constant 0 : i32
    %c0_i32_1 = arith.constant 0 : i32
    return %c0_i32, %c0_i32_0 : i32, i32
  }
  func.func @transform_4(%arg0: i32, %arg1: i32) -> (i32, i32) {
    %c0_i32 = arith.constant 0 : i32
    %c0_i32_0 = arith.constant 0 : i32
    %c0_i32_1 = arith.constant 0 : i32
    return %c0_i32, %c0_i32_0 : i32, i32
  }
  func.func @transform_5(%arg0: i32, %arg1: i32) -> (i32, i32, i32) {
    %c0_i32 = arith.constant 0 : i32
    %c0_i32_0 = arith.constant 0 : i32
    return %arg0, %arg1, %c0_i32 : i32, i32, i32
  }
}

</mosaic_0001>

<bundles_post_ra>
// kernel: tpu_custom_call.1
= control target key start
LH: loop header
LB: loop body
LE: loop exit
PB: predicated region body
PF: predicated region fallthrough
CT: control target
= control target key end

     0   :  { %10 = vsyncpa [#allocation3], 0  ;;  %s978_s0 = inlined_call_operand.hbm [shape: f32[2,8,32], index: 0, kind: input, shape index: {}]   ;;  %s979_s1 = inlined_call_operand.hbm [shape: f32[1,8,32], index: 1, kind: input, shape index: {}]   ;;  %s980_s2 = inlined_call_operand.hbm [shape: f32[2,8,32], index: 2, kind: input, shape index: {}]   ;;  %s981_s3 = inlined_call_operand.vmem [shape: f32[1,32], index: 3, kind: input, shape index: {}]   ;;  %s982_s4 = inlined_call_operand.vmem [shape: f32[1,32], index: 4, kind: input, shape index: {}]   ;;  %s983_s5 = inlined_call_operand.hbm [shape: bf16[2,8,32], index: 5, kind: output, shape index: {}]  }
   0x1   :  { %12 = vsyncpa [#allocation3 + $0x1], 0 }
   0x2   :  { %13 = vsyncpa [#allocation6], 0 }
   0x3   :  { %14 = vsyncpa [#allocation4], 0 }
   0x4   :  { %16 = vsyncpa [#allocation4 + $0x1], 0  ;;  %s787_s18 = smov 0   ;;  %s789_s19 = smov 0  }
   0x5   :  { %s791_s20 = smov 0   ;;  %s793_s21 = smov 0  }
   0x6   :  { %s795_s22 = smov 0   ;;  %s797_s23 = smov 0  }
   0x7 LB: > { %s34_s24 = sadd.s32 1, %s747_s22  ;;  %s43_s25 = sadd.s32 1, %s739_s20  ;;  %s751_s23 = sphi %s797_s23, %s22_s23   ;;  %s747_s22 = sphi %s795_s22, %s1004_s22   ;;  %s743_s21 = sphi %s793_s21, %s1003_s21   ;;  %s739_s20 = sphi %s791_s20, %s1002_s20   ;;  %s735_s19 = sphi %s789_s19, %s1001_s19   ;;  %s731_s18 = sphi %s787_s18, %s1000_s18  }
   0x8   : > { %p36_p0 = scmp.ge.s32.totalorder %s34_s24, 2  ;;  %p50_p1 = scmp.ne.s32.totalorder %s739_s20, %s735_s19 }
   0x9   : > { %p51_p2 = scmp.eq.s32.totalorder %s751_s23, 0  ;;  %p527_p5 = scmp.lt.s32.totalorder %s751_s23, 2 }
   0xa   : > { %s1006_s24 = smov (%p36_p0, %s34_s24), 0  ;;  %s223_s27 = sand.u32 1, %s751_s23  }
   0xb   : > { %p52_p4 = por %p51_p2, %p50_p1  ;;  %s38_s26 = ssub.s32 %s747_s22, %s1006_s24 }
   0xc   : > { %p41_p6 = scmp.eq.s32.totalorder %s38_s26, 0  ;;  %s225_s28 = sand.u32 1, %s739_s20  }
   0xd   : > { %s487_s29 = sshll.u32 %s747_s22, 7  ;;  %s837_s6 = sshll.u32 %s225_s28, 3 }
   0xe   : > { %s835_s30 = scalar_select %p41_p6, %s739_s20, %s43_s25  }
   0xf   : > { %s233_s9 = scalar_lea.hbm %s978_s0, %s487_s29  ;;  %p844_p7 = pnand %p527_p5, %p52_p4 }
  0x10   : > { %s227_s11 = scalar_lea.vmem [#allocation2], %s837_s6  ;;  %s849_s13 = scalar_lea.sflag [#allocation3], %s223_s27 }
  0x11   : > { %s235_s12 = sshll.u32 %s227_s11, 4  ;;  %p583_p8 = pneg %p844_p7  ;;  %s236_s12 = int_to_ptr.vmem [resolvable:$true] %s235_s12 }
  0x12   : > { %s594_s14 = scalar_lea.vmem %s236_s12, 128  ;;  %s753_s15 = smov [#allocation2]  }
  0x13   : > { %p595_p9 = scmp.ne.s32.totalorder %s236_s12, %s594_s14  ;;  %s599_s16 = sshll.u32 %s753_s15, 4  ;;  %s600_s16 = int_to_ptr.vmem [resolvable:$false] %s599_s16 }
  0x14   : > { %s601_s17 = scalar_lea.vmem %s600_s16, 256  ;;  %p602_p12 = scmp.lt.s32.totalorder %s236_s12, %s600_s16 }
  0x15   : > { %p597_p10 = pnand %p595_p9, %p583_p8  ;;  %p603_p13 = scmp.lt.s32.totalorder %s601_s17, %s594_s14 }
  0x17   : > { %p598_p11 = pneg %p597_p10  ;;  %p604_p0 = por %p603_p13, %p602_p12 }
  0x19   : > { %p605_p2 = pnand %p604_p0, %p598_p11 }
  0x1b   : > { %608 = shalt.err (!%p605_p2)
}
  0x1c   : > { %518 = dma.hbm_to_vmem [thread:$0]  (!%p844_p7), %s233_s9, 128, %s236_s12, %s849_s13  }
  0x1d   : > { %s860_s25 = sadd.s32 4294967295, %s751_s23   ;;  %s482_s26 = sadd.s32 4294967294, %s751_s23  }
  0x1e   : > { %p56_p4 = scmp.ne.s32.totalorder %s735_s19, %s731_s18  ;;  %p984_p5 = scmp.eq.s32.totalorder %s860_s25, 0 }
  0x1f   : > { %p178_p6 = scmp.eq.s32.totalorder %s860_s25, 1  ;;  %p184_p9 = scmp.eq.s32.totalorder %s482_s26, 1 }
  0x20   : > { %p483_p10 = scmp.ge.s32.totalorder %s751_s23, 1  ;;  %p870_p11 = por %p984_p5, %p56_p4 }
  0x21   : > { %p877_p12 = por %p178_p6, %p50_p1  ;;  %p881_p13 = por %p184_p9, %p56_p4 }
  0x22   : > { %s988_s27 = scalar_select %p870_p11, 1, 0 }
  0x23   : > { %s989_s28 = scalar_select %p877_p12, 1, 0 }
  0x24   : > { %s990_s7 = scalar_select %p881_p13, 1, 0 }
  0x25   : > { %p191_p0 = scmp.lt.s32.totalorder %s751_s23, 3  ;;  %s252_s11 = scalar_lea.hbm %s980_s2, %s487_s29 }
  0x26   : > { %s754_s14 = smov [#allocation5]   ;;  %s246_s16 = scalar_lea.vmem [#allocation7], %s837_s6 }
  0x27   : > { %p891_p2 = pnand %p483_p10, %p191_p0  ;;  %s206_s15 = sshll.u32 %s754_s14, 4  ;;  %s207_s15 = int_to_ptr.vmem [resolvable:$true] %s206_s15 }
  0x28   : > { %s254_s17 = sshll.u32 %s246_s16, 4  ;;  %s755_s8 = smov [#allocation7]   ;;  %s255_s17 = int_to_ptr.vmem [resolvable:$true] %s254_s17 }
  0x29   : > { %s622_s26 = scalar_lea.vmem %s255_s17, 128  ;;  %s627_s29 = sshll.u32 %s755_s8, 4  ;;  %s628_s29 = int_to_ptr.vmem [resolvable:$false] %s627_s29 }
  0x2a   : > { %p623_p4 = scmp.ne.s32.totalorder %s255_s17, %s622_s26  ;;  %s629_s9 = scalar_lea.vmem %s628_s29, 256 }
  0x2b   : > { %p630_p10 = scmp.lt.s32.totalorder %s255_s17, %s628_s29  ;;  %p631_p0 = scmp.lt.s32.totalorder %s629_s9, %s622_s26 }
  0x2c   : > { %p625_p6 = pnand %p623_p4, %p583_p8 }
  0x2d   : > { %p632_p3 = por %p631_p0, %p630_p10 }
  0x2e   : > { %p626_p9 = pneg %p625_p6 }
  0x30   : > { %p633_p5 = pnand %p632_p3, %p626_p9 }
  0x32   : > { %636 = shalt.err (!%p633_p5)
}
  0x33   : > { %521 = dma.hbm_to_vmem [thread:$0]  (!%p844_p7), %s252_s11, 128, %s255_s17, %s849_s13  }
  0x34   : > { %p992_p1 = scmp.eq.s32.totalorder %s860_s25, 0  ;;  %p993_p8 = pneg %p891_p2 }
  0x35   : > { %s648_s6 = scalar_lea.vmem %s207_s15, 128  ;;  %p656_p0 = scmp.lt.s32.totalorder %s207_s15, %s207_s15 }
  0x36   : > { %p512_p4 = pnand %p993_p8, %p992_p1  ;;  %p649_p13 = scmp.ne.s32.totalorder %s207_s15, %s648_s6 }
  0x37   : > { %p657_p10 = scmp.lt.s32.totalorder %s648_s6, %s648_s6 }
  0x38   : > { %p639_p6 = pneg %p512_p4 }
  0x39   : > { %p658_p3 = por %p657_p10, %p656_p0 }
  0x3a   : > { %p651_p12 = pnand %p649_p13, %p639_p6 }
  0x3c   : > { %p652_p11 = pneg %p651_p12 }
  0x3e   : > { %p659_p5 = pnand %p658_p3, %p652_p11 }
  0x40   : > { %662 = shalt.err (!%p659_p5)
}
  0x41   : > { %514 = dma.hbm_to_vmem [thread:$0]  (!%p512_p4), %s979_s1, 128, %s207_s15, [#allocation6]  }
  0x42   : > { %263 = sbr.rel (%p891_p2) target bundleno = 406 (0x196), region = 40  ;;  %s265_s13 = sand.u32 (!%p891_p2), 1, %s860_s25  }
  0x43   : > { %s916_s11 = sand.u32 (!%p891_p2), 1, %s735_s19   ;;  %s266_s17 = scalar_lea.sflag (!%p891_p2), [#allocation3], %s265_s13 }
  0x44   : > { %s491_s16 = sshll.u32 (!%p891_p2), %s916_s11, 3  ;;  %p994_p7 = scmp.ne.s32.totalorder (!%p891_p2), %s988_s27, 0 }
  0x45   : > { %s269_s26 = scalar_lea.vmem (!%p891_p2), [#allocation2], %s491_s16 }
  0x47   : > { %714 = dma.done.wait (%p994_p7), %s266_s17, 128  }
  0x48   : > { %716 = vsyncadd (%p994_p7), %s266_s17, 4294967168  ;;  %p995_p11 = scmp.eq.s32.totalorder %s860_s25, 0 }
  0x4a   : > { %718 = dma.done.wait (%p995_p11), [#allocation6], 128   ;;  %p996_p12 = pmov %p995_p11 }
  0x4b   : > { %s282_s12 = scalar_lea.vmem [#allocation7], %s491_s16 }
  0x4c   : > { %720 = vsyncadd (%p996_p12), [#allocation6], 4294967168 }
  0x4d   : > { %722 = dma.done.wait (%p994_p7), %s266_s17, 128  }
  0x4e   : > { %724 = vsyncadd (%p994_p7), %s266_s17, 4294967168  ;;  %v314_v0 = vld [vmem:[%s269_s26] sm:$0xff]  ;;  %v315_v1 = vld [vmem:[#allocation5] sm:$0xff]  ;;  %vm319_vm0 = vcmask 261120   ;;  %s494_s25 = sshll.u32 %s916_s11, 2  ;;  %s498_s9 = sshll.u32 %s743_s21, 6 }
  0x4f   : > { %v317_v2 = vld [vmem:[%s282_s12] sm:$0xff]  ;;  %v316_v3 = vadd.f32 %v315_v1, %v314_v0  ;;  %s313_s6 = scalar_lea.vmem [#allocation8], %s494_s25  ;;  %vm351_vm1 = vcmask 257024   ;;  %s366_s16 = scalar_lea.hbm %s983_s5, %s498_s9 }
  0x50   : > { %v495_v15 = vld [vmem:[%s981_s3] ss:$0 sm:$0xff]  ;;  %s368_s10 = sshll.u32 %s313_s6, 4  ;;  %s354_s17 = scalar_lea.sflag [#allocation4], %s916_s11  ;;  %s369_s10 = int_to_ptr.vmem [resolvable:$true] %s368_s10 }
  0x51   : > { %v318_v4 = vadd.f32 %v317_v2, %v316_v3  ;;  %v496_v17 = vld [vmem:[%s982_s4] ss:$0 sm:$0xff]  ;;  %s663_s26 = scalar_lea.vmem %s369_s10, 64  ;;  %p997_p2 = scmp.ne.s32.totalorder %s989_s28, 0 }
  0x52   : > { %p664_p13 = scmp.ne.s32.totalorder %s369_s10, %s663_s26  ;;  %s756_s12 = smov [#allocation8]  }
  0x53   : > { %v320_v5 = vsel %vm319_vm0, %v318_v4, 0.0  ;;  %s667_s27 = sshll.u32 %s756_s12, 4  ;;  %s668_s27 = int_to_ptr.vmem [resolvable:$false] %s667_s27 }
  0x54   : > { %321 = vadd.xlane.f32.xlu0 %v320_v5  ;;  %p665_p1 = pnand %p664_p13, %p997_p2  ;;  %s669_s21 = scalar_lea.vmem %s668_s27, 128 }
  0x55   : > { %p670_p8 = scmp.lt.s32.totalorder %s369_s10, %s668_s27  ;;  %p671_p4 = scmp.lt.s32.totalorder %s669_s21, %s663_s26 }
  0x56   : > { %p666_p9 = pneg %p665_p1 }
  0x57   : > { %p672_p6 = por %p671_p4, %p670_p8 }
  0x59   : > { %p673_p0 = pnand %p672_p6, %p666_p9 }
  0xdd   : > { %v322_v6 = vpop.xlane.xlu0 %321 }
  0xde   : > { %v324_v7 = vmul.f32 0.03125, %v322_v6 }
  0xe0   : > { %v325_v8 = vsub.f32 %v318_v4, %v324_v7 }
  0xe2   : > { %v326_v9 = vmul.f32 %v325_v8, %v325_v8 }
  0xe4   : > { %v327_v10 = vsel %vm319_vm0, %v326_v9, 0.0 }
  0xe5   : > { %328 = vadd.xlane.f32.xlu0 %v327_v10 }
 0x16e   : > { %v329_v11 = vpop.xlane.xlu0 %328 }
 0x16f   : > { %v330_v12 = vmul.f32 0.03125, %v329_v11 }
 0x171   : > { %v331_v13 = vadd.f32 1e-12, %v330_v12 }
 0x173   : > { %579 = vrsqrt.f32 %v331_v13 }
 0x180   : > { %v580_v14 = vpop.eup %579 }
 0x181   : > { %v333_v16 = vmul.f32 %v580_v14, %v325_v8 }
 0x183   : > { %v341_v18 = vmul.f32 %v495_v15, %v333_v16 }
 0x185   : > { %v349_v19 = vadd.f32 %v496_v17, %v341_v18 }
 0x187   : > { %v350_v20 = vpack.c.bf16 %v349_v19, %v349_v19 }
 0x189   : > { %352 = vst.msk [vmem:[%s313_s6] sm:$0xf] %vm351_vm1, %v350_v20 }
 0x18a   : > { %676 = shalt.err (!%p673_p0)
}
 0x18b   : > { %s677_s25 = scalar_lea.hbm %s366_s16, 64  ;;  %s681_s8 = scalar_lea.hbm %s983_s5, 128 }
 0x18c   : > { %p678_p10 = scmp.ne.s32.totalorder %s366_s16, %s677_s25  ;;  %p682_p7 = scmp.lt.s32.totalorder %s366_s16, %s983_s5 }
 0x18d   : > { %p683_p11 = scmp.lt.s32.totalorder %s681_s8, %s677_s25 }
 0x18e   : > { %p679_p3 = pnand %p678_p10, %p997_p2 }
 0x18f   : > { %p684_p12 = por %p683_p11, %p682_p7 }
 0x190   : > { %p680_p5 = pneg %p679_p3 }
 0x192   : > { %p685_p13 = pnand %p684_p12, %p680_p5 }
 0x194   : > { %688 = shalt.err (!%p685_p13)
}
 0x195   : > { %509 = dma.vmem_to_hbm [thread:$0]  (%p997_p2), %s369_s10, 64, %s366_s16, %s354_s17  }
 0x196 PF: > { %s380_s6 = sand.u32 1, %s731_s18   ;;  %p998_p1 = scmp.ne.s32.totalorder %s990_s7, 0 }
 0x197   : > { %p999_p9 = scmp.ge.s32.totalorder %s751_s23, 2  ;;  %s381_s14 = scalar_lea.sflag [#allocation4], %s380_s6 }
 0x199   : > { %p523_p8 = pnand %p999_p9, %p998_p1 }
 0x19b   : > { %p524_p4 = pneg %p523_p8 }
 0x19d   : > { %726 = dma.done.wait (%p524_p4), %s381_s14, 64  }
 0x19e   : > { %728 = vsyncadd (%p524_p4), %s381_s14, 4294967232  ;;  %s22_s23 = sadd.s32 1, %s751_s23   ;;  %s1000_s18 = smov %s735_s19 }
 0x19f   : > { %p19_p6 = scmp.ge.s32.totalorder %s22_s23, 4   ;;  %s1001_s19 = smov %s739_s20 }
 0x1a0   : > { %s1002_s20 = smov %s835_s30  ;;  %s1003_s21 = smov %s747_s22 }
 0x1a1   : > { %s1004_s22 = smov %s1006_s24  ;;  %21 = sbr.rel (!%p19_p6) target bundleno = 7 (0x7), region = 101 }
 0x1a6   :  { %386 = vsyncpa [#allocation3], 1 }
 0x1a7   :  { %388 = vsyncpa [#allocation3 + $0x1], 1 }
 0x1a8   :  { %389 = vsyncpa [#allocation6], 1 }
 0x1a9   :  { %390 = vsyncpa [#allocation4], 1 }
 0x1aa   :  { %392 = vsyncpa [#allocation4 + $0x1], 1 }

</bundles_post_ra>
